<compile_context>
chip_gen: v6e
topology: v6e:2x2x1
jax: 0.10.0
libtpu: 0.0.40
codegen_flags: <defaults>
</compile_context>

<pallas_src>
import math

import jax
import jax.numpy as jnp
from jax.experimental import pallas as pl
from jax.experimental.pallas import tpu as pltpu


# ----------------------------------------------------------------------------- pe table
def _build_pe_table(d_model: int, max_len: int = 5000, dtype=jnp.float32) -> jnp.ndarray:
    """Sinusoidal positional-encoding buffer, shape (1, max_len, d_model).

    Built in fp32 and cast ONCE to the model dtype here (init time), never per call.
    """
    assert d_model % 2 == 0, "PositionalEncoding (PyTorch parity) requires even d_model"
    position = jnp.arange(0, max_len, dtype=jnp.float32)[:, None]              # (max_len, 1)
    div_term = jnp.exp(
        jnp.arange(0, d_model, 2, dtype=jnp.float32) * (-math.log(10000.0) / d_model)
    )                                                                           # (d/2,)
    angles = position * div_term                                                # (max_len, d/2)
    pe = jnp.zeros((max_len, d_model), dtype=jnp.float32)
    pe = pe.at[:, 0::2].set(jnp.sin(angles))
    pe = pe.at[:, 1::2].set(jnp.cos(angles))
    return pe[None, :, :].astype(dtype)                                         # (1, max_len, d)


# ------------------------------------------------------------------------------- kernel
def _add_pe_kernel(x_ref, pe_ref, o_ref):
    # Elementwise (broadcast) add; shared by the 3-D tiled path ((tile_s, tile_d) blocks)
    # and the masked fallback ((B, tile_f) + (1, tile_f) blocks).
    o_ref[...] = (x_ref[...] + pe_ref[...]).astype(o_ref.dtype)


# --------------------------------------------------------------------------- VMEM plan
def _vmem_plan():
    """Per-operand block budget + explicit scoped-VMEM limit, generation-aware.

    3 operands x 2 pipeline buffers = 6 live blocks; keep them inside a limit we request
    explicitly: <=32 MiB (v6e/v7x default scoped VMEM; raises v5e's 16 MiB default, still
    far below its 128 MiB physical VMEM) and never more than half of physical VMEM
    (v7x only has 64 MiB physical).
    """
    try:
        cap = pltpu.get_tpu_info().vmem_capacity_bytes
    except Exception:
        return 2 * 1024 * 1024, None          # conservative fallback (fits every default)
    limit = min(32 * 1024 * 1024, cap // 2)
    budget = limit // 8                        # 6 blocks + slack -> 4 MiB at a 32 MiB limit
    return budget, limit


def _pick_tiles(B: int, S: int, D: int, itemsize: int, budget: int):
    """(tile_s, tile_d) for a (B, S, D) array; lane-tiles D only if a min block overflows."""
    sub = {4: 8, 2: 16, 1: 32}.get(itemsize, 8)            # sublane quantum per dtype
    if D * sub * itemsize <= budget:
        tile_d = D
        max_rows = max(sub, (budget // (D * itemsize)) // sub * sub)
        tile_s = S if S <= max_rows else max_rows
    else:
        # Huge-D guard: even sub rows x D overflows the budget -> tile the lane dim too.
        tile_s = min(S, sub)
        tile_d = min(D, max(128, (budget // (max(tile_s, 1) * itemsize)) // 128 * 128))
    # v7x megacore: make sure the grid has >=2 steps so both TensorCores get work.
    if B * pl.cdiv(S, tile_s) * pl.cdiv(D, tile_d) < 2 and S > sub:
        half = pl.cdiv(S, 2)
        tile_s = max(sub, ((half + sub - 1) // sub) * sub)
    return tile_s, tile_d


def _pick_tile_f(total: int, B: int, itemsize: int, budget: int) -> int:
    rows = max(B, 8)                                        # B rows pad to >=8 sublanes anyway
    max_lanes = max(128, (budget // (rows * itemsize)) // 128 * 128)
    if total <= max_lanes:
        return total                                        # one full-width block (legal: full dim)
    return max_lanes                                        # multiple of 128 (legal by divisibility)


def _pick_lane_width(total: int, cap: int = 1024) -> int:
    """Largest multiple of 128 <= cap that divides total (total is a multiple of 128)."""
    for k in range(cap // 128, 0, -1):
        if total % (128 * k) == 0:
            return 128 * k
    return 128


# ------------------------------------------------------------------------ tiled 3-D add
def _add_pe_tiled(x, pe, *, budget, vmem_limit, donate_x=False):
    """x: (B, S, D); pe: (1, >=S, D) in x.dtype.  Returns x + pe[:, :S, :]."""
    B, S, D = x.shape
    tile_s, tile_d = _pick_tiles(B, S, D, x.dtype.itemsize, budget)

    # Keep pe's row block legal under the (8,128) rule: tile_s is either a multiple of 8
    # or equal to S; in the latter case make the block equal pe's full row dim by slicing
    # pe down to exactly S rows (a tiny S*D copy, unlike a whole-table op).
    if tile_s % 8 != 0 and pe.shape[1] != S:
        pe = jax.lax.slice(pe, (0, 0, 0), (1, S, D))

    grid = (pl.cdiv(S, tile_s), pl.cdiv(D, tile_d), B)      # b innermost -> pe block reused
    extra = {"input_output_aliases": {0: 0}} if donate_x else {}
    return pl.pallas_call(
        _add_pe_kernel,
        out_shape=jax.ShapeDtypeStruct((B, S, D), x.dtype),
        grid=grid,
        in_specs=[
            pl.BlockSpec((None, tile_s, tile_d), lambda s, d, b: (b, s, d)),   # x (batch squeezed)
            pl.BlockSpec((None, tile_s, tile_d), lambda s, d, b: (0, s, d)),   # pe (constant over b)
        ],
        out_specs=pl.BlockSpec((None, tile_s, tile_d), lambda s, d, b: (b, s, d)),
        compiler_params=pltpu.CompilerParams(
            dimension_semantics=("parallel", "parallel", "parallel"),
            vmem_limit_bytes=vmem_limit),
        **extra,
    )(x, pe)


# ------------------------------------------------------------------------------ wrapper
def positional_encoding(x: jnp.ndarray, pe: jnp.ndarray, *, donate_x: bool = False):
    """x: (B, S, D); pe: (1, max_len, D) already in the model dtype. Returns x + pe[:, :S, :]."""
    B, S, D = x.shape
    assert pe.ndim == 3 and pe.shape[0] == 1 and pe.shape[2] == D and S <= pe.shape[1]
    if pe.dtype != x.dtype:
        # Defensive only — build pe in the model dtype at init (see _build_pe_table) so
        # this whole-table cast never runs in the hot path.
        pe = pe.astype(x.dtype)

    budget, vmem_limit = _vmem_plan()

    if D % 128 == 0:
        # D already lane-dense: tile S (and, if ever needed, D), keep pe resident over B.
        return _add_pe_tiled(x, pe, budget=budget, vmem_limit=vmem_limit, donate_x=donate_x)

    total = S * D
    max_len = pe.shape[1]
    if total % 128 == 0:
        # Lane-dense flattening: (B, S, D) -> (B, total/L, L) with L a multiple of 128, so
        # x/out blocks are fully (8,128)-dense even at small batch, and reuse the 3-D path.
        L = _pick_lane_width(total)
        R = total // L
        x3 = x.reshape(B, R, L)
        if (max_len * D) % L == 0:
            pe3 = pe.reshape(1, (max_len * D) // L, L)       # free reshape of the full table
        else:
            pe3 = jax.lax.slice(pe, (0, 0, 0), (1, S, D)).reshape(1, R, L)  # tiny S*D copy
        out = _add_pe_tiled(x3, pe3, budget=budget, vmem_limit=vmem_limit, donate_x=donate_x)
        return out.reshape(B, S, D)

    # Last resort (S*D not a multiple of 128): lane-padded (B, S*D) layout with masked
    # stores on the ragged edge.  pe is sliced to S rows (tiny) so its block is legal.
    x2 = x.reshape(B, total)
    pe2 = jax.lax.slice(pe, (0, 0, 0), (1, S, D)).reshape(1, total)
    tile_f = _pick_tile_f(total, B, x.dtype.itemsize, budget)
    grid = (pl.cdiv(total, tile_f),)
    extra = {"input_output_aliases": {0: 0}} if donate_x else {}
    out2 = pl.pallas_call(
        _add_pe_kernel,
        out_shape=jax.ShapeDtypeStruct((B, total), x.dtype),
        grid=grid,
        in_specs=[
            pl.BlockSpec((B, tile_f), lambda t: (0, t)),     # x: all batches per tile
            pl.BlockSpec((1, tile_f), lambda t: (0, t)),     # pe: broadcast over batch in-kernel
        ],
        out_specs=pl.BlockSpec((B, tile_f), lambda t: (0, t)),
        compiler_params=pltpu.CompilerParams(
            dimension_semantics=("parallel",), vmem_limit_bytes=vmem_limit),
        **extra,
    )(x2, pe2)
    return out2.reshape(B, S, D)


# --------------------------------------------------------------------------------- demo
if __name__ == "__main__":
    max_len = 5000
    key = jax.random.PRNGKey(0)
    k1, k2, k3 = jax.random.split(key, 3)

    # (a) Module-scale shape (d_model=32): S*D is a multiple of 128 -> lane-dense
    #     flattened 3-D path (pe table reshaped for free, no whole-table copy).
    B, S, D = 2, 8, 32
    x = jax.random.normal(k1, (B, S, D), dtype=jnp.float32)
    pe = _build_pe_table(D, max_len, dtype=x.dtype)          # built in model dtype at init
    out = jax.block_until_ready(positional_encoding(x, pe))
    ref = x + pe[:, :S, :]
    assert out.shape == (B, S, D)
    assert jnp.allclose(out, ref, atol=1e-6), "mismatch vs reference (flattened path)"

    # (b) Lane-aligned d_model (multiple of 128) -> direct 3-D tiled path, pe resident over B.
    B2, S2, D2 = 2, 16, 128
    x2 = jax.random.normal(k2, (B2, S2, D2), dtype=jnp.float32)
    pe2 = _build_pe_table(D2, max_len, dtype=x2.dtype)
    out2 = jax.block_until_ready(positional_encoding(x2, pe2))
    assert jnp.allclose(out2, x2 + pe2[:, :S2, :], atol=1e-6), "mismatch (3-D tiled path)"

    # (c) Ragged shape (S*D not a multiple of 128) -> masked (B, S*D) fallback.
    B3, S3, D3 = 2, 7, 20
    x3 = jax.random.normal(k3, (B3, S3, D3), dtype=jnp.float32)
    pe3 = _build_pe_table(D3, max_len, dtype=x3.dtype)
    out3 = jax.block_until_ready(positional_encoding(x3, pe3))
    assert jnp.allclose(out3, x3 + pe3[:, :S3, :], atol=1e-6), "mismatch (ragged fallback)"

    print("KERNEL_OK")
</pallas_src>

<mosaic_0001>
module attributes {stable_mosaic.version = 11 : i64} {
  func.func @_add_pe_kernel(%arg0: i32, %arg1: i32, %arg2: i32, %arg3: memref<1x1x256xf32, #tpu.memory_space<vmem>>, %arg4: memref<1x1x256xf32, #tpu.memory_space<vmem>>, %arg5: memref<1x1x256xf32, #tpu.memory_space<vmem>>) attributes {dimension_semantics = [#tpu.dimension_semantics<parallel>, #tpu.dimension_semantics<parallel>, #tpu.dimension_semantics<parallel>], iteration_bounds = array<i64: 1, 1, 2>, scalar_prefetch = 0 : i64, scratch_operands = 0 : i64, tpu.core_type = #tpu.core_type<tc>, window_params = [{transform_indices = @transform_0, window_bounds = array<i64: 1, 1, 256>}, {transform_indices = @transform_1, window_bounds = array<i64: 1, 1, 256>}, {transform_indices = @transform_2, window_bounds = array<i64: 1, 1, 256>}]} {
    %c0 = arith.constant 0 : index
    %c0_0 = arith.constant 0 : index
    %c0_1 = arith.constant 0 : index
    %0 = vector.load %arg3[%c0, %c0_0, %c0_1] : memref<1x1x256xf32, #tpu.memory_space<vmem>>, vector<1x1x256xf32>
    %1 = vector.shape_cast %0 : vector<1x1x256xf32> to vector<1x256xf32>
    %c0_2 = arith.constant 0 : index
    %c0_3 = arith.constant 0 : index
    %c0_4 = arith.constant 0 : index
    %2 = vector.load %arg4[%c0_2, %c0_3, %c0_4] : memref<1x1x256xf32, #tpu.memory_space<vmem>>, vector<1x1x256xf32>
    %3 = vector.shape_cast %2 : vector<1x1x256xf32> to vector<1x256xf32>
    %4 = arith.addf %1, %3 : vector<1x256xf32>
    %c0_5 = arith.constant 0 : index
    %c0_6 = arith.constant 0 : index
    %c0_7 = arith.constant 0 : index
    %5 = vector.load %arg5[%c0_5, %c0_6, %c0_7] : memref<1x1x256xf32, #tpu.memory_space<vmem>>, vector<1x1x256xf32>
    %6 = vector.shape_cast %5 : vector<1x1x256xf32> to vector<1x256xf32>
    %7 = vector.shape_cast %4 : vector<1x256xf32> to vector<1x1x256xf32>
    tpu.vector_store %arg5[%c0_5, %c0_6, %c0_7], %7 {strides = array<i32>} : memref<1x1x256xf32, #tpu.memory_space<vmem>>, vector<1x1x256xf32>,
    return
  }
  func.func @transform_0(%arg0: i32, %arg1: i32, %arg2: i32) -> (i32, i32, i32) {
    %c0_i32 = arith.constant 0 : i32
    return %arg2, %arg0, %arg1 : i32, i32, i32
  }
  func.func @transform_1(%arg0: i32, %arg1: i32, %arg2: i32) -> (i32, i32, i32) {
    %c0_i32 = arith.constant 0 : i32
    %c0_i32_0 = arith.constant 0 : i32
    return %c0_i32, %arg0, %arg1 : i32, i32, i32
  }
  func.func @transform_2(%arg0: i32, %arg1: i32, %arg2: i32) -> (i32, i32, i32) {
    %c0_i32 = arith.constant 0 : i32
    return %arg2, %arg0, %arg1 : i32, i32, i32
  }
}

</mosaic_0001>

<bundles_post_ra>
// kernel: tpu_custom_call.1
= control target key start
LH: loop header
LB: loop body
LE: loop exit
PB: predicated region body
PF: predicated region fallthrough
CT: control target
= control target key end

     0   :  { %7 = vsyncpa [#allocation3], 0  ;;  %s763_s0 = inlined_call_operand.hbm [shape: f32[2,1,256], index: 0, kind: input, shape index: {}]   ;;  %s764_s1 = inlined_call_operand.hbm [shape: f32[1,1,256], index: 1, kind: input, shape index: {}]   ;;  %s765_s2 = inlined_call_operand.hbm [shape: f32[2,1,256], index: 2, kind: output, shape index: {}]  }
   0x1   :  { %9 = vsyncpa [#allocation3 + $0x1], 0 }
   0x2   :  { %10 = vsyncpa [#allocation6], 0 }
   0x3   :  { %11 = vsyncpa [#allocation4], 0 }
   0x4   :  { %13 = vsyncpa [#allocation4 + $0x1], 0  ;;  %s602_s9 = smov 0   ;;  %s604_s10 = smov 0  }
   0x5   :  { %s606_s11 = smov 0   ;;  %s608_s12 = smov 0  }
   0x6   :  { %s610_s13 = smov 0   ;;  %s612_s14 = smov 0  }
   0x7 LB: > { %s352_s15 = sadd.s32 4294967295, %s582_s14   ;;  %s353_s16 = sadd.s32 4294967294, %s582_s14   ;;  %s582_s14 = sphi %s612_s14, %s19_s14   ;;  %s578_s13 = sphi %s610_s13, %s782_s13   ;;  %s574_s12 = sphi %s608_s12, %s781_s12   ;;  %s570_s11 = sphi %s606_s11, %s780_s11   ;;  %s566_s10 = sphi %s604_s10, %s779_s10   ;;  %s562_s9 = sphi %s602_s9, %s778_s9  }
   0x8   : > { %p62_p0 = scmp.ne.s32.totalorder %s566_s10, %s562_s9  ;;  %p636_p1 = scmp.eq.s32.totalorder %s352_s15, 0 }
   0x9   : > { %p640_p2 = scmp.eq.s32.totalorder %s352_s15, 1  ;;  %p124_p3 = scmp.eq.s32.totalorder %s353_s16, 1 }
   0xa   : > { %p646_p4 = por %p636_p1, %p62_p0  ;;  %p354_p5 = scmp.ge.s32.totalorder %s582_s14, 1 }
   0xb   : > { %p651_p6 = por %p124_p3, %p62_p0  ;;  %p131_p7 = scmp.lt.s32.totalorder %s582_s14, 3 }
   0xc   : > { %s769_s19 = scalar_select %p646_p4, 1, 0 }
   0xd   : > { %s770_s20 = scalar_select %p651_p6, 1, 0 }
   0xe   : > { %p656_p8 = pnand %p354_p5, %p131_p7  ;;  %s584_s22 = smov [#allocation5]  }
   0xf   : > { %s149_s23 = sshll.u32 %s584_s22, 4  ;;  %s31_s25 = sadd.s32 1, %s578_s13  ;;  %s150_s23 = int_to_ptr.vmem [resolvable:$true] %s149_s23 }
  0x10   : > { %p379_p10 = pneg %p656_p8  ;;  %s49_s26 = sadd.s32 1, %s570_s11 }
  0x11   : > { %p32_p12 = scmp.ge.s32.totalorder %s31_s25, 2  ;;  %s455_s27 = scalar_lea.vmem %s150_s23, 32 }
  0x12   : > { %p665_p11 = pnand %p379_p10, %p636_p1  ;;  %p456_p0 = scmp.ne.s32.totalorder %s150_s23, %s455_s27 }
  0x13   : > { %p463_p7 = scmp.lt.s32.totalorder %s150_s23, %s150_s23  ;;  %p464_p6 = scmp.lt.s32.totalorder %s455_s27, %s455_s27 }
  0x14   : > { %p446_p13 = pneg %p665_p11 }
  0x15   : > { %p465_p9 = por %p464_p6, %p463_p7 }
  0x16   : > { %p458_p3 = pnand %p456_p0, %p446_p13 }
  0x18   : > { %p459_p5 = pneg %p458_p3 }
  0x1a   : > { %p466_p4 = pnand %p465_p9, %p459_p5 }
  0x1c   : > { %469 = shalt.err (!%p466_p4)
}
  0x1d   : > { %382 = dma.hbm_to_vmem [thread:$0]  (!%p665_p11), %s764_s1, 32, %s150_s23, [#allocation6]  }
  0x1e   : > { %s784_s25 = smov (%p32_p12, %s31_s25), 0  ;;  %p56_p6 = scmp.ne.s32.totalorder %s570_s11, %s566_s10 }
  0x1f   : > { %p57_p4 = scmp.eq.s32.totalorder %s582_s14, 0  ;;  %s42_s30 = ssub.s32 %s578_s13, %s784_s25 }
  0x20   : > { %p392_p9 = scmp.lt.s32.totalorder %s582_s14, 2  ;;  %p47_p10 = scmp.eq.s32.totalorder %s42_s30, 0 }
  0x21   : > { %p58_p13 = por %p57_p4, %p56_p6  ;;  %p688_p0 = por %p640_p2, %p56_p6 }
  0x22   : > { %s160_s4 = sand.u32 1, %s570_s11   ;;  %s369_s7 = sshll.u32 %s578_s13, 5 }
  0x23   : > { %s694_s5 = scalar_select %p47_p10, %s570_s11, %s49_s26  }
  0x24   : > { %s357_s6 = sshll.u32 %s160_s4, 1  ;;  %s174_s16 = scalar_lea.hbm %s763_s0, %s369_s7 }
  0x25   : > { %s164_s22 = scalar_lea.vmem [#allocation2], %s357_s6  ;;  %p700_p11 = pnand %p392_p9, %p58_p13 }
  0x26   : > { %s176_s23 = sshll.u32 %s164_s22, 4  ;;  %s161_s18 = scalar_lea.sflag [#allocation3], %s160_s4  ;;  %s177_s23 = int_to_ptr.vmem [resolvable:$true] %s176_s23 }
  0x27   : > { %p472_p2 = pneg %p700_p11  ;;  %s483_s27 = scalar_lea.vmem %s177_s23, 32 }
  0x28   : > { %p484_p12 = scmp.ne.s32.totalorder %s177_s23, %s483_s27  ;;  %s585_s26 = smov [#allocation2]  }
  0x29   : > { %s488_s28 = sshll.u32 %s585_s26, 4  ;;  %s489_s28 = int_to_ptr.vmem [resolvable:$false] %s488_s28 }
  0x2a   : > { %p486_p3 = pnand %p484_p12, %p472_p2  ;;  %s490_s29 = scalar_lea.vmem %s489_s28, 64 }
  0x2b   : > { %p491_p7 = scmp.lt.s32.totalorder %s177_s23, %s489_s28  ;;  %p492_p6 = scmp.lt.s32.totalorder %s490_s29, %s483_s27 }
  0x2c   : > { %p487_p5 = pneg %p486_p3 }
  0x2d   : > { %p493_p4 = por %p492_p6, %p491_p7 }
  0x2f   : > { %p494_p10 = pnand %p493_p4, %p487_p5 }
  0x31   : > { %497 = shalt.err (!%p494_p10)
}
  0x32   : > { %386 = dma.hbm_to_vmem [thread:$0]  (!%p700_p11), %s174_s16, 32, %s177_s23, %s161_s18  }
  0x33   : > { %185 = sbr.rel (%p656_p8) target bundleno = 83 (0x53), region = 28  ;;  %s711_s30 = sand.u32 (!%p656_p8), 1, %s566_s10  }
  0x34   : > { %s361_s4 = sshll.u32 (!%p656_p8), %s711_s30, 1  ;;  %s188_s6 = scalar_lea.sflag (!%p656_p8), [#allocation3], %s711_s30 }
  0x35   : > { %s191_s7 = scalar_lea.vmem (!%p656_p8), [#allocation2], %s361_s4  ;;  %p775_p9 = scmp.ne.s32.totalorder (!%p656_p8), %s769_s19, 0 }
  0x38   : > { %549 = dma.done.wait (%p775_p9), %s188_s6, 32  }
  0x39   : > { %551 = vsyncadd (%p775_p9), %s188_s6, 4294967264 }
  0x3a   : > { %553 = dma.done.wait (%p636_p1), [#allocation6], 32  }
  0x3b   : > { %555 = vsyncadd (%p636_p1), [#allocation6], 4294967264  ;;  %v222_v0 = vlaneseq  ;;  %s215_s21 = scalar_lea.vmem [#allocation7], %s361_s4  ;;  %s370_s15 = sshll.u32 %s574_s12, 5  ;;  %v219_v1 = vld [vmem:[%s191_s7] sm:$0x3] }
  0x3c   : > { %s246_s8 = sshll.u32 %s215_s21, 4  ;;  %v220_v2 = vld [vmem:[#allocation5] sm:$0x3]  ;;  %s244_s22 = scalar_lea.hbm %s765_s2, %s370_s15  ;;  %s247_s8 = int_to_ptr.vmem [resolvable:$true] %s246_s8 }
  0x3d   : > { %vm224_vm0 = vcmp.lt.s32.totalorder %v222_v0, 256  ;;  %v221_v3 = vadd.f32 %v220_v2, %v219_v1  ;;  %s228_s23 = scalar_lea.sflag [#allocation4], %s711_s30  ;;  %s498_s17 = scalar_lea.vmem %s247_s8, 32 }
  0x3e   : > { %p499_p1 = scmp.ne.s32.totalorder %s247_s8, %s498_s17  ;;  %s586_s24 = smov [#allocation7]  }
  0x3f   : > { %226 = vst.msk [vmem:[%s215_s21] sm:$0x3] %vm224_vm0, %v221_v3  ;;  %s502_s18 = sshll.u32 %s586_s24, 4  ;;  %s503_s18 = int_to_ptr.vmem [resolvable:$false] %s502_s18 }
  0x40   : > { %p500_p8 = pnand %p499_p1, %p688_p0  ;;  %s504_s12 = scalar_lea.vmem %s503_s18, 64 }
  0x41   : > { %p505_p11 = scmp.lt.s32.totalorder %s247_s8, %s503_s18  ;;  %p506_p2 = scmp.lt.s32.totalorder %s504_s12, %s498_s17 }
  0x42   : > { %p501_p13 = pneg %p500_p8 }
  0x43   : > { %p507_p12 = por %p506_p2, %p505_p11 }
  0x45   : > { %p508_p3 = pnand %p507_p12, %p501_p13 }
  0x47   : > { %511 = shalt.err (!%p508_p3)
}
  0x48   : > { %s512_s27 = scalar_lea.hbm %s244_s22, 32  ;;  %s516_s29 = scalar_lea.hbm %s765_s2, 64 }
  0x49   : > { %p513_p5 = scmp.ne.s32.totalorder %s244_s22, %s512_s27  ;;  %p517_p4 = scmp.lt.s32.totalorder %s244_s22, %s765_s2 }
  0x4a   : > { %p518_p10 = scmp.lt.s32.totalorder %s516_s29, %s512_s27 }
  0x4b   : > { %p514_p7 = pnand %p513_p5, %p688_p0 }
  0x4c   : > { %p519_p9 = por %p518_p10, %p517_p4 }
  0x4d   : > { %p515_p6 = pneg %p514_p7 }
  0x4f   : > { %p520_p1 = pnand %p519_p9, %p515_p6 }
  0x51   : > { %523 = shalt.err (!%p520_p1)
}
  0x52   : > { %377 = dma.vmem_to_hbm [thread:$0]  (%p688_p0), %s247_s8, 32, %s244_s22, %s228_s23  }
  0x53 PF: > { %s258_s6 = sand.u32 1, %s562_s9   ;;  %p776_p8 = scmp.ne.s32.totalorder %s770_s20, 0 }
  0x54   : > { %p777_p13 = scmp.ge.s32.totalorder %s582_s14, 2  ;;  %s259_s7 = scalar_lea.sflag [#allocation4], %s258_s6 }
  0x56   : > { %p388_p11 = pnand %p777_p13, %p776_p8 }
  0x58   : > { %p389_p2 = pneg %p388_p11 }
  0x5a   : > { %557 = dma.done.wait (%p389_p2), %s259_s7, 32  }
  0x5b   : > { %559 = vsyncadd (%p389_p2), %s259_s7, 4294967264  ;;  %s19_s14 = sadd.s32 1, %s582_s14   ;;  %s778_s9 = smov %s566_s10 }
  0x5c   : > { %p16_p12 = scmp.ge.s32.totalorder %s19_s14, 4   ;;  %s779_s10 = smov %s570_s11 }
  0x5d   : > { %s780_s11 = smov %s694_s5  ;;  %s781_s12 = smov %s578_s13 }
  0x5e   : > { %s782_s13 = smov %s784_s25  ;;  %18 = sbr.rel (!%p16_p12) target bundleno = 7 (0x7), region = 78 }
  0x63   :  { %264 = vsyncpa [#allocation3], 1 }
  0x64   :  { %266 = vsyncpa [#allocation3 + $0x1], 1 }
  0x65   :  { %267 = vsyncpa [#allocation6], 1 }
  0x66   :  { %268 = vsyncpa [#allocation4], 1 }
  0x67   :  { %270 = vsyncpa [#allocation4 + $0x1], 1 }

</bundles_post_ra>
